<compile_context>
chip_gen: v5e
topology: v5e:2x2
jax: 0.10.0
libtpu: 0.0.40
codegen_flags: <defaults>
</compile_context>

<pallas_src>
import functools

import jax
import jax.numpy as jnp
from jax.experimental import pallas as pl
from jax.experimental.pallas import tpu as pltpu


def _round_up(n, m):
    return (n + m - 1) // m * m


def _decoder_kernel(*refs, num_layers):
    # refs = (x_ref, w0, b0, w1, b1, ..., w{L-1}, b{L-1}, out_ref)
    #   x_ref : (TB, Pin0)          compute-dtype batch tile (pipelined)
    #   w_l   : (Pin_l, Pout_l)     pre-transposed, per-layer padded (VMEM-resident)
    #   b_l   : (1, Pout_l)         f32 bias (VMEM-resident)
    x_ref, out_ref = refs[0], refs[-1]
    h = x_ref[...]
    for l in range(num_layers):  # static unroll; L is a compile-time constant
        w = refs[1 + 2 * l][...]
        b = refs[2 + 2 * l][...]
        # MXU in the operand dtype (f32 or bf16), accumulate in f32.
        y = jnp.dot(h, w, preferred_element_type=jnp.float32) + b
        if l < num_layers - 1:
            # Bias add + ReLU in f32; cast back to operand dtype for next MXU pass.
            h = jnp.maximum(y, 0.0).astype(w.dtype)
        else:
            h = y  # no ReLU on the last layer
    out_ref[...] = h.astype(out_ref.dtype)


def pack_params(weights, biases, compute_dtype=jnp.float32):
    """One-time (setup-time) packing: transpose, per-layer pad to (8,128), cast.

    weights: list of PyTorch-convention (out_dim, in_dim) matrices.
    biases : list of (out_dim,) vectors.
    Returns a tuple of (w_padded_T, b_padded) pairs, one per layer.
    """
    packed = []
    for w, b in zip(weights, biases):
        out_d, in_d = w.shape
        pi, po = _round_up(in_d, 128), _round_up(out_d, 128)
        wt = jnp.pad(jnp.asarray(w, compute_dtype).T,
                     ((0, pi - in_d), (0, po - out_d)))
        bp = jnp.pad(jnp.asarray(b, jnp.float32), (0, po - out_d)).reshape(1, po)
        packed.append((wt, bp))
    return tuple(packed)


@functools.partial(jax.jit, static_argnames=("final_dim", "out_dtype"))
def action_decoder_forward(x, packed_params, *, final_dim, out_dtype=jnp.float32):
    """Fused ActionDecoder forward.

    x             : (B, internal_dim)
    packed_params : output of pack_params (per-layer padded/transposed weights)
    final_dim     : true (unpadded) output feature count
    out_dtype     : dtype of the kernel's HBM writeback
    returns       : (B, final_dim) in out_dtype
    """
    B, in_dim = x.shape
    L = len(packed_params)
    compute_dtype = packed_params[0][0].dtype
    p_in0 = packed_params[0][0].shape[0]
    p_out_last = packed_params[-1][0].shape[1]

    # Batch tiling: large tiles to amortize per-grid-step overhead, but at least
    # two grid steps whenever B allows it so the "parallel" axis can be sharded
    # across v7x's two TensorCores.
    b8 = _round_up(B, 8)
    if b8 <= 8:
        tb = 8
    elif b8 <= 1024:
        tb = min(512, _round_up(b8 // 2, 8))
    else:
        tb = 512
    b_pad = _round_up(b8, tb)

    xk = x.astype(compute_dtype)
    if b_pad != B or p_in0 != in_dim:
        # Zero padding is exact: padded feature lanes stay 0 through every
        # Linear(+ReLU); padded batch rows are sliced off below.
        xk = jnp.pad(xk, ((0, b_pad - B), (0, p_in0 - in_dim)))

    in_specs = [pl.BlockSpec((tb, p_in0), lambda i: (i, 0))]   # x: pipelined
    flat_args = [xk]
    for w, b in packed_params:
        # Grid-invariant index maps: weights/biases DMA once, stay in VMEM.
        in_specs.append(pl.BlockSpec(w.shape, lambda i: (0, 0)))
        in_specs.append(pl.BlockSpec(b.shape, lambda i: (0, 0)))
        flat_args += [w, b]

    out_pad = pl.pallas_call(
        functools.partial(_decoder_kernel, num_layers=L),
        out_shape=jax.ShapeDtypeStruct((b_pad, p_out_last), out_dtype),
        grid=(b_pad // tb,),
        in_specs=in_specs,
        out_specs=pl.BlockSpec((tb, p_out_last), lambda i: (i, 0)),
        compiler_params=pltpu.CompilerParams(
            dimension_semantics=("parallel",),  # batch tiles are independent
        ),
    )(*flat_args)

    return out_pad[:B, :final_dim]


def _reference_forward(x, weights, biases, compute_dtype=jnp.float32):
    """Pure-JAX reference with the same operand dtype / f32 accumulation."""
    h = x.astype(compute_dtype)
    L = len(weights)
    for l, (w, b) in enumerate(zip(weights, biases)):
        h = jnp.dot(h, w.T.astype(compute_dtype),
                    preferred_element_type=jnp.float32) + b.astype(jnp.float32)
        if l < L - 1:
            h = jnp.maximum(h, 0.0).astype(compute_dtype)
    return h


if __name__ == "__main__":
    internal_dim = 128
    final_output_dim = 4
    B = 32  # small, but >= 2 batch tiles so the parallel grid axis is exercised

    # Layer widths exactly as the PyTorch module builds them.
    dims = [
        internal_dim, internal_dim, internal_dim, internal_dim,   # abstract_layers
        internal_dim // 2, internal_dim // 4, internal_dim // 8,  # reduction_layers
        internal_dim // 16, final_output_dim,
    ]

    key = jax.random.PRNGKey(0)
    weights, biases = [], []
    for l in range(len(dims) - 1):
        key, kw, kb = jax.random.split(key, 3)
        in_d, out_d = dims[l], dims[l + 1]
        scale = 1.0 / jnp.sqrt(jnp.float32(in_d))
        weights.append(scale * jax.random.normal(kw, (out_d, in_d), jnp.float32))
        biases.append(scale * jax.random.normal(kb, (out_d,), jnp.float32))

    key, kx = jax.random.split(key)
    x = jax.random.normal(kx, (B, internal_dim), jnp.float32)

    # ---- f32 path (matches the PyTorch module's numerics) -------------------
    packed_f32 = pack_params(weights, biases, jnp.float32)  # one-time setup cost
    out_f32 = action_decoder_forward(
        x, packed_f32, final_dim=final_output_dim, out_dtype=jnp.float32)
    out_f32 = jax.block_until_ready(out_f32)
    ref_f32 = _reference_forward(x, weights, biases, jnp.float32)
    assert out_f32.shape == (B, final_output_dim), out_f32.shape
    assert jnp.allclose(out_f32, ref_f32, atol=2e-3, rtol=2e-3), "f32 mismatch"

    # ---- bf16-operand path (MXU-native on v5e/v6e; f32 accumulation) --------
    packed_bf16 = pack_params(weights, biases, jnp.bfloat16)
    out_bf16 = action_decoder_forward(
        x, packed_bf16, final_dim=final_output_dim, out_dtype=jnp.bfloat16)
    out_bf16 = jax.block_until_ready(out_bf16)
    ref_bf16 = _reference_forward(x, weights, biases, jnp.bfloat16)
    assert out_bf16.shape == (B, final_output_dim), out_bf16.shape
    assert jnp.allclose(out_bf16.astype(jnp.float32),
                        ref_bf16.astype(jnp.float32),
                        atol=2e-2, rtol=2e-2), "bf16 mismatch"

    print("KERNEL_OK")
</pallas_src>

<mosaic_0001>
module attributes {stable_mosaic.version = 11 : i64} {
  func.func @_decoder_kernel(%arg0: i32, %arg1: memref<16x128xf32, #tpu.memory_space<vmem>>, %arg2: memref<128x128xf32, #tpu.memory_space<vmem>>, %arg3: memref<1x128xf32, #tpu.memory_space<vmem>>, %arg4: memref<128x128xf32, #tpu.memory_space<vmem>>, %arg5: memref<1x128xf32, #tpu.memory_space<vmem>>, %arg6: memref<128x128xf32, #tpu.memory_space<vmem>>, %arg7: memref<1x128xf32, #tpu.memory_space<vmem>>, %arg8: memref<128x128xf32, #tpu.memory_space<vmem>>, %arg9: memref<1x128xf32, #tpu.memory_space<vmem>>, %arg10: memref<128x128xf32, #tpu.memory_space<vmem>>, %arg11: memref<1x128xf32, #tpu.memory_space<vmem>>, %arg12: memref<128x128xf32, #tpu.memory_space<vmem>>, %arg13: memref<1x128xf32, #tpu.memory_space<vmem>>, %arg14: memref<128x128xf32, #tpu.memory_space<vmem>>, %arg15: memref<1x128xf32, #tpu.memory_space<vmem>>, %arg16: memref<128x128xf32, #tpu.memory_space<vmem>>, %arg17: memref<1x128xf32, #tpu.memory_space<vmem>>, %arg18: memref<16x128xf32, #tpu.memory_space<vmem>>) attributes {dimension_semantics = [#tpu.dimension_semantics<parallel>], iteration_bounds = array<i64: 2>, scalar_prefetch = 0 : i64, scratch_operands = 0 : i64, tpu.core_type = #tpu.core_type<tc>, window_params = [{transform_indices = @transform_0, window_bounds = array<i64: 16, 128>}, {pipeline_mode = #tpu.pipeline_mode<synchronous>, transform_indices = @transform_1, window_bounds = array<i64: 128, 128>}, {pipeline_mode = #tpu.pipeline_mode<synchronous>, transform_indices = @transform_2, window_bounds = array<i64: 1, 128>}, {pipeline_mode = #tpu.pipeline_mode<synchronous>, transform_indices = @transform_3, window_bounds = array<i64: 128, 128>}, {pipeline_mode = #tpu.pipeline_mode<synchronous>, transform_indices = @transform_4, window_bounds = array<i64: 1, 128>}, {pipeline_mode = #tpu.pipeline_mode<synchronous>, transform_indices = @transform_5, window_bounds = array<i64: 128, 128>}, {pipeline_mode = #tpu.pipeline_mode<synchronous>, transform_indices = @transform_6, window_bounds = array<i64: 1, 128>}, {pipeline_mode = #tpu.pipeline_mode<synchronous>, transform_indices = @transform_7, window_bounds = array<i64: 128, 128>}, {pipeline_mode = #tpu.pipeline_mode<synchronous>, transform_indices = @transform_8, window_bounds = array<i64: 1, 128>}, {pipeline_mode = #tpu.pipeline_mode<synchronous>, transform_indices = @transform_9, window_bounds = array<i64: 128, 128>}, {pipeline_mode = #tpu.pipeline_mode<synchronous>, transform_indices = @transform_10, window_bounds = array<i64: 1, 128>}, {pipeline_mode = #tpu.pipeline_mode<synchronous>, transform_indices = @transform_11, window_bounds = array<i64: 128, 128>}, {pipeline_mode = #tpu.pipeline_mode<synchronous>, transform_indices = @transform_12, window_bounds = array<i64: 1, 128>}, {pipeline_mode = #tpu.pipeline_mode<synchronous>, transform_indices = @transform_13, window_bounds = array<i64: 128, 128>}, {pipeline_mode = #tpu.pipeline_mode<synchronous>, transform_indices = @transform_14, window_bounds = array<i64: 1, 128>}, {pipeline_mode = #tpu.pipeline_mode<synchronous>, transform_indices = @transform_15, window_bounds = array<i64: 128, 128>}, {pipeline_mode = #tpu.pipeline_mode<synchronous>, transform_indices = @transform_16, window_bounds = array<i64: 1, 128>}, {transform_indices = @transform_17, window_bounds = array<i64: 16, 128>}]} {
    %c0 = arith.constant 0 : index
    %c0_0 = arith.constant 0 : index
    %0 = vector.load %arg1[%c0, %c0_0] : memref<16x128xf32, #tpu.memory_space<vmem>>, vector<16x128xf32>
    %c0_1 = arith.constant 0 : index
    %c0_2 = arith.constant 0 : index
    %1 = vector.load %arg2[%c0_1, %c0_2] : memref<128x128xf32, #tpu.memory_space<vmem>>, vector<128x128xf32>
    %c0_3 = arith.constant 0 : index
    %c0_4 = arith.constant 0 : index
    %2 = vector.load %arg3[%c0_3, %c0_4] : memref<1x128xf32, #tpu.memory_space<vmem>>, vector<1x128xf32>
    %cst = arith.constant dense<0.000000e+00> : vector<16x128xf32>
    %3 = tpu.matmul %0, %1, %cst {dimension_numbers = #tpu.dot_dimension_numbers<[1], [0], [0], [1], [0, 0, 1, 1], [], []>} : vector<16x128xf32>, vector<128x128xf32>, vector<16x128xf32> -> vector<16x128xf32>
    %4 = vector.broadcast %2 : vector<1x128xf32> to vector<16x128xf32>
    %5 = arith.addf %3, %4 : vector<16x128xf32>
    %cst_5 = arith.constant 0.000000e+00 : f32
    %6 = vector.broadcast %cst_5 : f32 to vector<16x128xf32>
    %7 = arith.maximumf %5, %6 : vector<16x128xf32>
    %c0_6 = arith.constant 0 : index
    %c0_7 = arith.constant 0 : index
    %8 = vector.load %arg4[%c0_6, %c0_7] : memref<128x128xf32, #tpu.memory_space<vmem>>, vector<128x128xf32>
    %c0_8 = arith.constant 0 : index
    %c0_9 = arith.constant 0 : index
    %9 = vector.load %arg5[%c0_8, %c0_9] : memref<1x128xf32, #tpu.memory_space<vmem>>, vector<1x128xf32>
    %cst_10 = arith.constant dense<0.000000e+00> : vector<16x128xf32>
    %10 = tpu.matmul %7, %8, %cst_10 {dimension_numbers = #tpu.dot_dimension_numbers<[1], [0], [0], [1], [0, 0, 1, 1], [], []>} : vector<16x128xf32>, vector<128x128xf32>, vector<16x128xf32> -> vector<16x128xf32>
    %11 = vector.broadcast %9 : vector<1x128xf32> to vector<16x128xf32>
    %12 = arith.addf %10, %11 : vector<16x128xf32>
    %cst_11 = arith.constant 0.000000e+00 : f32
    %13 = vector.broadcast %cst_11 : f32 to vector<16x128xf32>
    %14 = arith.maximumf %12, %13 : vector<16x128xf32>
    %c0_12 = arith.constant 0 : index
    %c0_13 = arith.constant 0 : index
    %15 = vector.load %arg6[%c0_12, %c0_13] : memref<128x128xf32, #tpu.memory_space<vmem>>, vector<128x128xf32>
    %c0_14 = arith.constant 0 : index
    %c0_15 = arith.constant 0 : index
    %16 = vector.load %arg7[%c0_14, %c0_15] : memref<1x128xf32, #tpu.memory_space<vmem>>, vector<1x128xf32>
    %cst_16 = arith.constant dense<0.000000e+00> : vector<16x128xf32>
    %17 = tpu.matmul %14, %15, %cst_16 {dimension_numbers = #tpu.dot_dimension_numbers<[1], [0], [0], [1], [0, 0, 1, 1], [], []>} : vector<16x128xf32>, vector<128x128xf32>, vector<16x128xf32> -> vector<16x128xf32>
    %18 = vector.broadcast %16 : vector<1x128xf32> to vector<16x128xf32>
    %19 = arith.addf %17, %18 : vector<16x128xf32>
    %cst_17 = arith.constant 0.000000e+00 : f32
    %20 = vector.broadcast %cst_17 : f32 to vector<16x128xf32>
    %21 = arith.maximumf %19, %20 : vector<16x128xf32>
    %c0_18 = arith.constant 0 : index
    %c0_19 = arith.constant 0 : index
    %22 = vector.load %arg8[%c0_18, %c0_19] : memref<128x128xf32, #tpu.memory_space<vmem>>, vector<128x128xf32>
    %c0_20 = arith.constant 0 : index
    %c0_21 = arith.constant 0 : index
    %23 = vector.load %arg9[%c0_20, %c0_21] : memref<1x128xf32, #tpu.memory_space<vmem>>, vector<1x128xf32>
    %cst_22 = arith.constant dense<0.000000e+00> : vector<16x128xf32>
    %24 = tpu.matmul %21, %22, %cst_22 {dimension_numbers = #tpu.dot_dimension_numbers<[1], [0], [0], [1], [0, 0, 1, 1], [], []>} : vector<16x128xf32>, vector<128x128xf32>, vector<16x128xf32> -> vector<16x128xf32>
    %25 = vector.broadcast %23 : vector<1x128xf32> to vector<16x128xf32>
    %26 = arith.addf %24, %25 : vector<16x128xf32>
    %cst_23 = arith.constant 0.000000e+00 : f32
    %27 = vector.broadcast %cst_23 : f32 to vector<16x128xf32>
    %28 = arith.maximumf %26, %27 : vector<16x128xf32>
    %c0_24 = arith.constant 0 : index
    %c0_25 = arith.constant 0 : index
    %29 = vector.load %arg10[%c0_24, %c0_25] : memref<128x128xf32, #tpu.memory_space<vmem>>, vector<128x128xf32>
    %c0_26 = arith.constant 0 : index
    %c0_27 = arith.constant 0 : index
    %30 = vector.load %arg11[%c0_26, %c0_27] : memref<1x128xf32, #tpu.memory_space<vmem>>, vector<1x128xf32>
    %cst_28 = arith.constant dense<0.000000e+00> : vector<16x128xf32>
    %31 = tpu.matmul %28, %29, %cst_28 {dimension_numbers = #tpu.dot_dimension_numbers<[1], [0], [0], [1], [0, 0, 1, 1], [], []>} : vector<16x128xf32>, vector<128x128xf32>, vector<16x128xf32> -> vector<16x128xf32>
    %32 = vector.broadcast %30 : vector<1x128xf32> to vector<16x128xf32>
    %33 = arith.addf %31, %32 : vector<16x128xf32>
    %cst_29 = arith.constant 0.000000e+00 : f32
    %34 = vector.broadcast %cst_29 : f32 to vector<16x128xf32>
    %35 = arith.maximumf %33, %34 : vector<16x128xf32>
    %c0_30 = arith.constant 0 : index
    %c0_31 = arith.constant 0 : index
    %36 = vector.load %arg12[%c0_30, %c0_31] : memref<128x128xf32, #tpu.memory_space<vmem>>, vector<128x128xf32>
    %c0_32 = arith.constant 0 : index
    %c0_33 = arith.constant 0 : index
    %37 = vector.load %arg13[%c0_32, %c0_33] : memref<1x128xf32, #tpu.memory_space<vmem>>, vector<1x128xf32>
    %cst_34 = arith.constant dense<0.000000e+00> : vector<16x128xf32>
    %38 = tpu.matmul %35, %36, %cst_34 {dimension_numbers = #tpu.dot_dimension_numbers<[1], [0], [0], [1], [0, 0, 1, 1], [], []>} : vector<16x128xf32>, vector<128x128xf32>, vector<16x128xf32> -> vector<16x128xf32>
    %39 = vector.broadcast %37 : vector<1x128xf32> to vector<16x128xf32>
    %40 = arith.addf %38, %39 : vector<16x128xf32>
    %cst_35 = arith.constant 0.000000e+00 : f32
    %41 = vector.broadcast %cst_35 : f32 to vector<16x128xf32>
    %42 = arith.maximumf %40, %41 : vector<16x128xf32>
    %c0_36 = arith.constant 0 : index
    %c0_37 = arith.constant 0 : index
    %43 = vector.load %arg14[%c0_36, %c0_37] : memref<128x128xf32, #tpu.memory_space<vmem>>, vector<128x128xf32>
    %c0_38 = arith.constant 0 : index
    %c0_39 = arith.constant 0 : index
    %44 = vector.load %arg15[%c0_38, %c0_39] : memref<1x128xf32, #tpu.memory_space<vmem>>, vector<1x128xf32>
    %cst_40 = arith.constant dense<0.000000e+00> : vector<16x128xf32>
    %45 = tpu.matmul %42, %43, %cst_40 {dimension_numbers = #tpu.dot_dimension_numbers<[1], [0], [0], [1], [0, 0, 1, 1], [], []>} : vector<16x128xf32>, vector<128x128xf32>, vector<16x128xf32> -> vector<16x128xf32>
    %46 = vector.broadcast %44 : vector<1x128xf32> to vector<16x128xf32>
    %47 = arith.addf %45, %46 : vector<16x128xf32>
    %cst_41 = arith.constant 0.000000e+00 : f32
    %48 = vector.broadcast %cst_41 : f32 to vector<16x128xf32>
    %49 = arith.maximumf %47, %48 : vector<16x128xf32>
    %c0_42 = arith.constant 0 : index
    %c0_43 = arith.constant 0 : index
    %50 = vector.load %arg16[%c0_42, %c0_43] : memref<128x128xf32, #tpu.memory_space<vmem>>, vector<128x128xf32>
    %c0_44 = arith.constant 0 : index
    %c0_45 = arith.constant 0 : index
    %51 = vector.load %arg17[%c0_44, %c0_45] : memref<1x128xf32, #tpu.memory_space<vmem>>, vector<1x128xf32>
    %cst_46 = arith.constant dense<0.000000e+00> : vector<16x128xf32>
    %52 = tpu.matmul %49, %50, %cst_46 {dimension_numbers = #tpu.dot_dimension_numbers<[1], [0], [0], [1], [0, 0, 1, 1], [], []>} : vector<16x128xf32>, vector<128x128xf32>, vector<16x128xf32> -> vector<16x128xf32>
    %53 = vector.broadcast %51 : vector<1x128xf32> to vector<16x128xf32>
    %54 = arith.addf %52, %53 : vector<16x128xf32>
    %c0_47 = arith.constant 0 : index
    %c0_48 = arith.constant 0 : index
    %55 = vector.load %arg18[%c0_47, %c0_48] : memref<16x128xf32, #tpu.memory_space<vmem>>, vector<16x128xf32>
    tpu.vector_store %arg18[%c0_47, %c0_48], %54 {strides = array<i32>} : memref<16x128xf32, #tpu.memory_space<vmem>>, vector<16x128xf32>,
    return
  }
  func.func @transform_0(%arg0: i32) -> (i32, i32) {
    %c0_i32 = arith.constant 0 : i32
    %c0_i32_0 = arith.constant 0 : i32
    return %arg0, %c0_i32 : i32, i32
  }
  func.func @transform_1(%arg0: i32) -> (i32, i32) {
    %c0_i32 = arith.constant 0 : i32
    %c0_i32_0 = arith.constant 0 : i32
    %c0_i32_1 = arith.constant 0 : i32
    return %c0_i32, %c0_i32_0 : i32, i32
  }
  func.func @transform_2(%arg0: i32) -> (i32, i32) {
    %c0_i32 = arith.constant 0 : i32
    %c0_i32_0 = arith.constant 0 : i32
    %c0_i32_1 = arith.constant 0 : i32
    return %c0_i32, %c0_i32_0 : i32, i32
  }
  func.func @transform_3(%arg0: i32) -> (i32, i32) {
    %c0_i32 = arith.constant 0 : i32
    %c0_i32_0 = arith.constant 0 : i32
    %c0_i32_1 = arith.constant 0 : i32
    return %c0_i32, %c0_i32_0 : i32, i32
  }
  func.func @transform_4(%arg0: i32) -> (i32, i32) {
    %c0_i32 = arith.constant 0 : i32
    %c0_i32_0 = arith.constant 0 : i32
    %c0_i32_1 = arith.constant 0 : i32
    return %c0_i32, %c0_i32_0 : i32, i32
  }
  func.func @transform_5(%arg0: i32) -> (i32, i32) {
    %c0_i32 = arith.constant 0 : i32
    %c0_i32_0 = arith.constant 0 : i32
    %c0_i32_1 = arith.constant 0 : i32
    return %c0_i32, %c0_i32_0 : i32, i32
  }
  func.func @transform_6(%arg0: i32) -> (i32, i32) {
    %c0_i32 = arith.constant 0 : i32
    %c0_i32_0 = arith.constant 0 : i32
    %c0_i32_1 = arith.constant 0 : i32
    return %c0_i32, %c0_i32_0 : i32, i32
  }
  func.func @transform_7(%arg0: i32) -> (i32, i32) {
    %c0_i32 = arith.constant 0 : i32
    %c0_i32_0 = arith.constant 0 : i32
    %c0_i32_1 = arith.constant 0 : i32
    return %c0_i32, %c0_i32_0 : i32, i32
  }
  func.func @transform_8(%arg0: i32) -> (i32, i32) {
    %c0_i32 = arith.constant 0 : i32
    %c0_i32_0 = arith.constant 0 : i32
    %c0_i32_1 = arith.constant 0 : i32
    return %c0_i32, %c0_i32_0 : i32, i32
  }
  func.func @transform_9(%arg0: i32) -> (i32, i32) {
    %c0_i32 = arith.constant 0 : i32
    %c0_i32_0 = arith.constant 0 : i32
    %c0_i32_1 = arith.constant 0 : i32
    return %c0_i32, %c0_i32_0 : i32, i32
  }
  func.func @transform_10(%arg0: i32) -> (i32, i32) {
    %c0_i32 = arith.constant 0 : i32
    %c0_i32_0 = arith.constant 0 : i32
    %c0_i32_1 = arith.constant 0 : i32
    return %c0_i32, %c0_i32_0 : i32, i32
  }
  func.func @transform_11(%arg0: i32) -> (i32, i32) {
    %c0_i32 = arith.constant 0 : i32
    %c0_i32_0 = arith.constant 0 : i32
    %c0_i32_1 = arith.constant 0 : i32
    return %c0_i32, %c0_i32_0 : i32, i32
  }
  func.func @transform_12(%arg0: i32) -> (i32, i32) {
    %c0_i32 = arith.constant 0 : i32
    %c0_i32_0 = arith.constant 0 : i32
    %c0_i32_1 = arith.constant 0 : i32
    return %c0_i32, %c0_i32_0 : i32, i32
  }
  func.func @transform_13(%arg0: i32) -> (i32, i32) {
    %c0_i32 = arith.constant 0 : i32
    %c0_i32_0 = arith.constant 0 : i32
    %c0_i32_1 = arith.constant 0 : i32
    return %c0_i32, %c0_i32_0 : i32, i32
  }
  func.func @transform_14(%arg0: i32) -> (i32, i32) {
    %c0_i32 = arith.constant 0 : i32
    %c0_i32_0 = arith.constant 0 : i32
    %c0_i32_1 = arith.constant 0 : i32
    return %c0_i32, %c0_i32_0 : i32, i32
  }
  func.func @transform_15(%arg0: i32) -> (i32, i32) {
    %c0_i32 = arith.constant 0 : i32
    %c0_i32_0 = arith.constant 0 : i32
    %c0_i32_1 = arith.constant 0 : i32
    return %c0_i32, %c0_i32_0 : i32, i32
  }
  func.func @transform_16(%arg0: i32) -> (i32, i32) {
    %c0_i32 = arith.constant 0 : i32
    %c0_i32_0 = arith.constant 0 : i32
    %c0_i32_1 = arith.constant 0 : i32
    return %c0_i32, %c0_i32_0 : i32, i32
  }
  func.func @transform_17(%arg0: i32) -> (i32, i32) {
    %c0_i32 = arith.constant 0 : i32
    %c0_i32_0 = arith.constant 0 : i32
    return %arg0, %c0_i32 : i32, i32
  }
}

</mosaic_0001>

<bundles_post_ra>
// kernel: action_decoder_forward.1
= control target key start
LH: loop header
LB: loop body
LE: loop exit
PB: predicated region body
PF: predicated region fallthrough
CT: control target
= control target key end

     0   :  { %s2012_s0 = inlined_call_operand.hbm [shape: f32[32,128], index: 0, kind: input, shape index: {}]   ;;  %s2013_s1 = inlined_call_operand.hbm [shape: f32[128,128], index: 1, kind: input, shape index: {}]   ;;  %s2014_s2 = inlined_call_operand.vmem [shape: f32[1,128], index: 2, kind: input, shape index: {}]   ;;  %s2015_s3 = inlined_call_operand.hbm [shape: f32[128,128], index: 3, kind: input, shape index: {}]   ;;  %s2016_s4 = inlined_call_operand.vmem [shape: f32[1,128], index: 4, kind: input, shape index: {}]   ;;  %s2017_s5 = inlined_call_operand.hbm [shape: f32[128,128], index: 5, kind: input, shape index: {}]   ;;  %s2018_s6 = inlined_call_operand.vmem [shape: f32[1,128], index: 6, kind: input, shape index: {}]   ;;  %s2019_s7 = inlined_call_operand.hbm [shape: f32[128,128], index: 7, kind: input, shape index: {}]   ;;  %s2020_s8 = inlined_call_operand.vmem [shape: f32[1,128], index: 8, kind: input, shape index: {}]   ;;  %s2021_s9 = inlined_call_operand.hbm [shape: f32[128,128], index: 9, kind: input, shape index: {}]   ;;  %s2022_s10 = inlined_call_operand.vmem [shape: f32[1,128], index: 10, kind: input, shape index: {}]   ;;  %s2023_s11 = inlined_call_operand.hbm [shape: f32[128,128], index: 11, kind: input, shape index: {}]   ;;  %s2024_s12 = inlined_call_operand.vmem [shape: f32[1,128], index: 12, kind: input, shape index: {}]   ;;  %s2025_s13 = inlined_call_operand.hbm [shape: f32[128,128], index: 13, kind: input, shape index: {}]   ;;  %s2026_s14 = inlined_call_operand.vmem [shape: f32[1,128], index: 14, kind: input, shape index: {}]   ;;  %s2027_s15 = inlined_call_operand.hbm [shape: f32[128,128], index: 15, kind: input, shape index: {}]   ;;  %s2028_s16 = inlined_call_operand.vmem [shape: f32[1,128], index: 16, kind: input, shape index: {}]   ;;  %s2029_s17 = inlined_call_operand.vmem [shape: f32[32,128], index: 17, kind: output, shape index: {}]  }
   0x1   :  { %2034 = sst [smem:[#allocation21_spill]] %s2012_s0 }
   0x2   :  { %2035 = sst [smem:[#allocation22_spill]] %s2013_s1 }
   0x3   :  { %2036 = sst [smem:[#allocation23_spill]] %s2015_s3 }
   0x4   :  { %2037 = sst [smem:[#allocation24_spill]] %s2017_s5 }
   0x5   :  { %2038 = sst [smem:[#allocation25_spill]] %s2021_s9 }
   0x6   :  { %2039 = sst [smem:[#allocation26_spill]] %s2024_s12 }
   0x7   :  { %2040 = sst [smem:[#allocation27_spill]] %s2026_s14 }
   0x8   :  { %2041 = sst [smem:[#allocation28_spill]] %s2028_s16 }
   0x9   :  { %2042 = sst [smem:[#allocation29_spill]] %s2029_s17 }
   0xa   :  { %22 = vsyncpa [#allocation3], 0 }
   0xb   :  { %24 = vsyncpa [#allocation3 + $0x1], 0 }
   0xc   :  { %25 = vsyncpa [#allocation5], 0 }
   0xd   :  { %26 = vsyncpa [#allocation8], 0 }
   0xe   :  { %27 = vsyncpa [#allocation11], 0 }
   0xf   :  { %28 = vsyncpa [#allocation14], 0  ;;  %s1792_s24 = smov 0   ;;  %s1794_s25 = smov 0  }
  0x10   :  { %s1796_s26 = smov 0   ;;  %s1798_s27 = smov 0  }
  0x11 LB: > { %s2043_s0 = sld [smem:[#allocation22_spill]]  ;;  %s2031_s18 = sadd.s32 4294967295, %s1690_s27   ;;  %s1690_s27 = sphi %s1798_s27, %s2063_s27   ;;  %s1686_s26 = sphi %s1796_s26, %s2062_s26   ;;  %s1682_s25 = sphi %s1794_s25, %s2061_s25   ;;  %s1678_s24 = sphi %s1792_s24, %s2060_s24  }
  0x12   : > { %p1212_p0 = scmp.ge.s32.totalorder %s1690_s27, 1  ;;  %p1819_p1 = scmp.eq.s32.totalorder %s2031_s18, 0 }
  0x13   : > { %p427_p2 = scmp.lt.s32.totalorder %s1690_s27, 3  ;;  %s1692_s20 = smov [#allocation4]  }
  0x14   : > { %s440_s21 = sshll.u32 %s1692_s20, 4  ;;  %s2046_s5 = sld [smem:[#allocation24_spill]]  ;;  %s441_s21 = int_to_ptr.vmem [resolvable:$true] %s440_s21 }
  0x15   : > { %p1824_p3 = pnand %p1212_p0, %p427_p2  ;;  %s2048_s9 = sld [smem:[#allocation25_spill]] }
  0x16   : > { %s1693_s17 = smov [#allocation7]   ;;  %s2032_s14 = smov 128  }
  0x17   : > { %s438_s30 = sshll.u32 %s2043_s0, 4  ;;  %p1274_p4 = pneg %p1824_p3  ;;  %s439_s30 = int_to_ptr.hbm [resolvable:$true] %s438_s30 }
  0x18   : > { %s474_s16 = sshll.u32 %s1693_s17, 4  ;;  %s2033_s12 = smov 8   ;;  %s475_s16 = int_to_ptr.vmem [resolvable:$true] %s474_s16 }
  0x19   : > { %p1835_p5 = pnand %p1274_p4, %p1819_p1  ;;  %s540_s23 = sshll.u32 %s2025_s13, 4  ;;  %s541_s23 = int_to_ptr.hbm [resolvable:$true] %s540_s23 }
  0x1a   : > { %s472_s28 = sshll.u32 %s2046_s5, 4  ;;  %s1696_s17 = smov [#allocation10]   ;;  %s473_s28 = int_to_ptr.hbm [resolvable:$true] %s472_s28 }
  0x1b   : > { %s506_s20 = sshll.u32 %s2048_s9, 4  ;;  %s508_s0 = sshll.u32 %s1696_s17, 4  ;;  %s507_s20 = int_to_ptr.hbm [resolvable:$true] %s506_s20  ;;  %s509_s0 = int_to_ptr.vmem [resolvable:$true] %s508_s0 }
  0x1c   : > { %1277 = dma.hbm_to_vmem [thread:$0]  (!%p1835_p5), %s439_s30, 2048, %s441_s21, [#allocation5], %s2032_s14, %s2032_s14, %s2033_s12  }
  0x1d   : > { %1283 = dma.hbm_to_vmem [thread:$0]  (!%p1835_p5), %s473_s28, 2048, %s475_s16, [#allocation8], %s2032_s14, %s2032_s14, %s2033_s12  }
  0x1e   : > { %1289 = dma.hbm_to_vmem [thread:$0]  (!%p1835_p5), %s507_s20, 2048, %s509_s0, [#allocation11], %s2032_s14, %s2032_s14, %s2033_s12  }
  0x1f   : > { %s1697_s30 = smov [#allocation13]   ;;  %s2049_s3 = sld [smem:[#allocation23_spill]] }
  0x20   : > { %s542_s21 = sshll.u32 %s1697_s30, 4  ;;  %s489_s18 = sshll.u32 %s2019_s7, 4  ;;  %s543_s21 = int_to_ptr.vmem [resolvable:$true] %s542_s21  ;;  %s490_s18 = int_to_ptr.hbm [resolvable:$true] %s489_s18 }
  0x21   : > { %1295 = dma.hbm_to_vmem [thread:$0]  (!%p1835_p5), %s541_s23, 2048, %s543_s21, [#allocation14], %s2032_s14, %s2032_s14, %s2033_s12  }
  0x22   : > { %s1698_s17 = smov [#allocation6]   ;;  %s1699_s5 = smov [#allocation9]  }
  0x23   : > { %s457_s20 = sshll.u32 %s1698_s17, 4  ;;  %s491_s9 = sshll.u32 %s1699_s5, 4  ;;  %s458_s20 = int_to_ptr.vmem [resolvable:$true] %s457_s20  ;;  %s492_s9 = int_to_ptr.vmem [resolvable:$true] %s491_s9 }
  0x24   : > { %s523_s30 = sshll.u32 %s2023_s11, 4  ;;  %s557_s28 = sshll.u32 %s2027_s15, 4  ;;  %s524_s30 = int_to_ptr.hbm [resolvable:$true] %s523_s30  ;;  %s558_s28 = int_to_ptr.hbm [resolvable:$true] %s557_s28 }
  0x25   : > { %s455_s16 = sshll.u32 %s2049_s3, 4  ;;  %s1700_s22 = smov [#allocation12]   ;;  %s456_s16 = int_to_ptr.hbm [resolvable:$true] %s455_s16 }
  0x26   : > { %1280 = dma.hbm_to_vmem [thread:$0]  (!%p1835_p5), %s456_s16, 2048, %s458_s20, [#allocation5], %s2032_s14, %s2032_s14, %s2033_s12  }
  0x27   : > { %1286 = dma.hbm_to_vmem [thread:$0]  (!%p1835_p5), %s490_s18, 2048, %s492_s9, [#allocation8], %s2032_s14, %s2032_s14, %s2033_s12  }
  0x28   : > { %s525_s17 = sshll.u32 %s1700_s22, 4  ;;  %s1701_s18 = smov [#allocation15]   ;;  %s526_s17 = int_to_ptr.vmem [resolvable:$true] %s525_s17 }
  0x29   : > { %1292 = dma.hbm_to_vmem [thread:$0]  (!%p1835_p5), %s524_s30, 2048, %s526_s17, [#allocation11], %s2032_s14, %s2032_s14, %s2033_s12  }
  0x2a   : > { %s559_s20 = sshll.u32 %s1701_s18, 4  ;;  %s1898_s5 = sadd.s32 1, %s1690_s27   ;;  %s560_s20 = int_to_ptr.vmem [resolvable:$true] %s559_s20 }
  0x2b   : > { %1298 = dma.hbm_to_vmem [thread:$0]  (!%p1835_p5), %s558_s28, 2048, %s560_s20, [#allocation14], %s2032_s14, %s2032_s14, %s2033_s12  }
  0x2c   : > { %s38_s9 = ssub.s32 %s1690_s27, %s1898_s5  ;;  %s41_s0 = sadd.s32 1, %s1686_s26 }
  0x2d   : > { %p39_p6 = scmp.eq.s32.totalorder %s38_s9, 0  ;;  %p48_p7 = scmp.ne.s32.totalorder %s1686_s26, %s1682_s25 }
  0x2e   : > { %p49_p8 = scmp.eq.s32.totalorder %s1690_s27, 0  ;;  %p54_p9 = scmp.ne.s32.totalorder %s1682_s25, %s1678_s24 }
  0x2f   : > { %s1909_s23 = scalar_select %p39_p6, %s1686_s26, %s41_s0  }
  0x30   : > { %p1913_p10 = por %p1819_p1, %p54_p9  ;;  %p1311_p11 = scmp.lt.s32.totalorder %s1690_s27, 2 }
  0x31   : > { %s576_s29 = sand.u32 1, %s1686_s26   ;;  %s1239_s21 = sshll.u32 %s1690_s27, 4 }
  0x32   : > { %p50_p12 = por %p49_p8, %p48_p7  ;;  %s1222_s16 = sshll.u32 %s576_s29, 4 }
  0x33   : > { %s2051_s17 = sld [smem:[#allocation21_spill]]  ;;  %s580_s9 = scalar_lea.vmem [#allocation2], %s1222_s16 }
  0x34   : > { %s588_s14 = sshll.u32 %s580_s9, 4  ;;  %p1923_p13 = pnand %p1311_p11, %p50_p12  ;;  %s589_s14 = int_to_ptr.vmem [resolvable:$true] %s588_s14 }
  0x35   : > { %s577_s0 = scalar_lea.sflag [#allocation3], %s576_s29 }
  0x36   : > { %p1614_p2 = pneg %p1923_p13 }
  0x39   : > { %s585_s18 = scalar_lea.hbm %s2051_s17, %s1239_s21  ;;  %s1617_s16 = scalar_lea.hbm %s2051_s17, 32 }
  0x3a   : > { %s586_s20 = sshll.u32 %s585_s18, 4  ;;  %s587_s20 = int_to_ptr.hbm [resolvable:$true] %s586_s20 }
  0x3b   : > { %s1610_s12 = sshra.s32 %s587_s20, 4  ;;  %s1611_s12 = int_to_ptr.hbm [resolvable:$true] %s1610_s12 }
  0x3c   : > { %s1612_s3 = scalar_lea.hbm %s1611_s12, 16  ;;  %p1618_p6 = scmp.lt.s32.totalorder %s1611_s12, %s2051_s17 }
  0x3d   : > { %p1613_p0 = scmp.ne.s32.totalorder %s1611_s12, %s1612_s3  ;;  %p1619_p7 = scmp.lt.s32.totalorder %s1617_s16, %s1612_s3 }
  0x3f   : > { %p1615_p4 = pnand %p1614_p2, %p1613_p0  ;;  %p1620_p8 = por %p1619_p7, %p1618_p6 }
  0x41   : > { %p1616_p5 = pneg %p1615_p4 }
  0x43   : > { %p1621_p9 = pnand %p1620_p8, %p1616_p5 }
  0x45   : > { %1624 = shalt.err (!%p1621_p9)
}
  0x46   : > { %s2053_s29 = smov 8   ;;  %s2054_s9 = smov 128  }
  0x47   : > { %1302 = dma.hbm_to_vmem [thread:$0]  (!%p1923_p13), %s587_s20, 256, %s589_s14, %s577_s0, %s2054_s9, %s2054_s9, %s2053_s29  }
  0x48   : > { %600 = sbr.rel (%p1824_p3) target bundleno = 1189 (0x4a5), region = 88  ;;  %s602_s21 = sand.u32 (!%p1824_p3), 1, %s1682_s25  }
  0x49   : > { %s1943_s28 = sshll.u32 (!%p1824_p3), %s602_s21, 4  ;;  %s603_s12 = scalar_lea.sflag (!%p1824_p3), [#allocation3], %s602_s21 }
  0x4a   : > { %s606_s3 = scalar_lea.vmem (!%p1824_p3), [#allocation2], %s1943_s28 }
  0x4d   : > { %1657 = dma.done.wait (%p1913_p10), %s603_s12, 256  }
  0x4e   : > { %1659 = vsyncadd (%p1913_p10), %s603_s12, 4294967040 }
  0x4f   : > { %1661 = dma.done.wait (%p1819_p1), [#allocation5], 4096  }
  0x50   : > { %1663 = vsyncadd (%p1819_p1), [#allocation5], 4294963200 }
  0x51   : > { %1665 = dma.done.wait (%p1819_p1), [#allocation8], 4096  }
  0x52   : > { %1667 = vsyncadd (%p1819_p1), [#allocation8], 4294963200 }
  0x53   : > { %1669 = dma.done.wait (%p1819_p1), [#allocation11], 4096  }
  0x54   : > { %1671 = vsyncadd (%p1819_p1), [#allocation11], 4294963200 }
  0x55   : > { %1673 = dma.done.wait (%p1819_p1), [#allocation14], 4096  }
  0x56   : > { %1675 = vsyncadd (%p1819_p1), [#allocation14], 4294963200  ;;  %v722_v0 = vld [vmem:[#allocation4 + $0x78] sm:$0xff]  ;;  %v721_v1 = vld [vmem:[#allocation4 + $0x70] sm:$0xff]  ;;  %s2055_s21 = sld [smem:[#allocation26_spill]]  ;;  %s2057_s14 = sadd.s32 4294967295, %s1690_s27  }
  0x57   : > { %727 = vmatpush.msra.mxu0 %v722_v0  ;;  %v720_v2 = vld [vmem:[#allocation4 + $0x68] sm:$0xff]  ;;  %v719_v3 = vld [vmem:[#allocation4 + $0x60] sm:$0xff]  ;;  %v718_v4 = vld [vmem:[#allocation4 + $0x58] sm:$0xff]  ;;  %s1235_s19 = sshll.u32 %s2057_s14, 1  ;;  %s2058_s24 = sld [smem:[#allocation28_spill]] }
  0x58   : > { %v717_v5 = vld [vmem:[#allocation4 + $0x50] sm:$0xff]  ;;  %v767_v6 = vld [vmem:[#allocation6 + $0x78] sm:$0xff]  ;;  %v716_v8 = vld [vmem:[#allocation4 + $0x48] sm:$0xff]  ;;  %p700_p1 = scmp.lt.s32.totalorder %s1235_s19, 3  ;;  %s2059_s22 = sld [smem:[#allocation29_spill]] }
  0x59   : > { %728 = vmatpush.msra.mxu0 %v721_v1  ;;  %v766_v7 = vld [vmem:[#allocation6 + $0x70] sm:$0xff]  ;;  %772 = vmatpush.msra.mxu1 %v767_v6  ;;  %v765_v9 = vld [vmem:[#allocation6 + $0x68] sm:$0xff]  ;;  %v715_v10 = vld [vmem:[#allocation4 + $0x40] sm:$0xff] }
  0x5a   : > { %v764_v11 = vld [vmem:[#allocation6 + $0x60] sm:$0xff]  ;;  %v714_v12 = vld [vmem:[#allocation4 + $0x38] sm:$0xff]  ;;  %v713_v14 = vld [vmem:[#allocation4 + $0x30] sm:$0xff]  ;;  %s2065_s19 = smov (!%p700_p1, %s1235_s19), 3 }
  0x5b   : > { %729 = vmatpush.msra.mxu0 %v720_v2  ;;  %773 = vmatpush.msra.mxu1 %v766_v7  ;;  %v763_v13 = vld [vmem:[#allocation6 + $0x58] sm:$0xff]  ;;  %v762_v15 = vld [vmem:[#allocation6 + $0x50] sm:$0xff]  ;;  %v712_v16 = vld [vmem:[#allocation4 + $0x28] sm:$0xff]  ;;  %s1236_s1 = sshll.u32 %s2065_s19, 3 }
  0x5c   : > { %v761_v17 = vld [vmem:[#allocation6 + $0x48] sm:$0xff]  ;;  %v711_v18 = vld [vmem:[#allocation4 + $0x20] sm:$0xff]  ;;  %v710_v20 = vld [vmem:[#allocation4 + $0x18] sm:$0xff] }
  0x5d   : > { %730 = vmatpush.msra.mxu0 %v719_v3  ;;  %774 = vmatpush.msra.mxu1 %v765_v9  ;;  %v760_v19 = vld [vmem:[#allocation6 + $0x40] sm:$0xff]  ;;  %v759_v21 = vld [vmem:[#allocation6 + $0x38] sm:$0xff]  ;;  %v709_v22 = vld [vmem:[#allocation4 + $0x10] sm:$0xff] }
  0x5e   : > { %v758_v23 = vld [vmem:[#allocation6 + $0x30] sm:$0xff]  ;;  %v708_v24 = vld [vmem:[#allocation4 + $0x8] sm:$0xff]  ;;  %v707_v26 = vld [vmem:[#allocation4] sm:$0xff]  ;;  %s703_s18 = scalar_lea.vmem %s2059_s22, %s1236_s1 }
  0x5f   : > { %731 = vmatpush.msra.mxu0 %v718_v4  ;;  %775 = vmatpush.msra.mxu1 %v764_v11  ;;  %v757_v25 = vld [vmem:[#allocation6 + $0x28] sm:$0xff]  ;;  %v756_v27 = vld [vmem:[#allocation6 + $0x20] sm:$0xff]  ;;  %v755_v29 = vld [vmem:[#allocation6 + $0x18] sm:$0xff] }
  0x60   : > { %v705_v28 = vld [vmem:[%s606_s3] sm:$0xff]  ;;  %v706_v30 = vld [vmem:[%s606_s3 + $0x8] sm:$0xff]  ;;  %s2056_s3 = sld [smem:[#allocation27_spill]] }
  0x61   : > { %732 = vmatpush.msra.mxu0 %v717_v5  ;;  %776 = vmatpush.msra.mxu1 %v763_v13  ;;  %v754_v31 = vld [vmem:[#allocation6 + $0x10] sm:$0xff]  ;;  %v753_v32 = vld [vmem:[#allocation6 + $0x8] sm:$0xff]  ;;  %v752_v33 = vld [vmem:[#allocation6] sm:$0xff] }
  0x62   : > { %v812_v34 = vld [vmem:[#allocation7 + $0x78] sm:$0xff]  ;;  %v811_v35 = vld [vmem:[#allocation7 + $0x70] sm:$0xff]  ;;  %v810_v36 = vld [vmem:[#allocation7 + $0x68] sm:$0xff] }
  0x63   : > { %733 = vmatpush.msra.mxu0 %v716_v8  ;;  %777 = vmatpush.msra.mxu1 %v762_v15  ;;  %v809_v37 = vld [vmem:[#allocation7 + $0x60] sm:$0xff]  ;;  %v808_v38 = vld [vmem:[#allocation7 + $0x58] sm:$0xff]  ;;  %v807_v39 = vld [vmem:[#allocation7 + $0x50] sm:$0xff] }
  0x64   : > { %817 = vmatpush.msra.mxu2 %v812_v34  ;;  %v806_v40 = vld [vmem:[#allocation7 + $0x48] sm:$0xff]  ;;  %v805_v41 = vld [vmem:[#allocation7 + $0x40] sm:$0xff]  ;;  %v804_v42 = vld [vmem:[#allocation7 + $0x38] sm:$0xff] }
  0x65   : > { %734 = vmatpush.msra.mxu0 %v715_v10  ;;  %778 = vmatpush.msra.mxu1 %v761_v17  ;;  %v1362_v43 = vld [vmem:[%s2014_s2] ss:$0 sm:$0xff]  ;;  %v803_v44 = vld [vmem:[#allocation7 + $0x30] sm:$0xff]  ;;  %v802_v45 = vld [vmem:[#allocation7 + $0x28] sm:$0xff] }
  0x66   : > { %818 = vmatpush.msra.mxu2 %v811_v35  ;;  %v801_v48 = vld [vmem:[#allocation7 + $0x20] sm:$0xff]  ;;  %v800_v50 = vld [vmem:[#allocation7 + $0x18] sm:$0xff]  ;;  %v799_v54 = vld [vmem:[#allocation7 + $0x10] sm:$0xff] }
  0x67   : > { %735 = vmatpush.msra.mxu0 %v714_v12  ;;  %779 = vmatpush.msra.mxu1 %v760_v19  ;;  %v798_v55 = vld [vmem:[#allocation7 + $0x8] sm:$0xff]  ;;  %v797_v56 = vld [vmem:[#allocation7] sm:$0xff]  ;;  %v857_v57 = vld [vmem:[#allocation9 + $0x78] sm:$0xff] }
  0x68   : > { %819 = vmatpush.msra.mxu2 %v810_v36  ;;  %v856_v58 = vld [vmem:[#allocation9 + $0x70] sm:$0xff]  ;;  %862 = vmatpush.msra.mxu3 %v857_v57  ;;  %v855_v59 = vld [vmem:[#allocation9 + $0x68] sm:$0xff]  ;;  %v854_v60 = vld [vmem:[#allocation9 + $0x60] sm:$0xff] }
  0x69   : > { %736 = vmatpush.msra.mxu0 %v713_v14  ;;  %780 = vmatpush.msra.mxu1 %v759_v21  ;;  %v853_v61 = vld [vmem:[#allocation9 + $0x58] sm:$0xff]  ;;  %v852_v62 = vld [vmem:[#allocation9 + $0x50] sm:$0xff]  ;;  %v851_v63 = vld [vmem:[#allocation9 + $0x48] sm:$0xff] }
  0x6a   : > { %820 = vmatpush.msra.mxu2 %v809_v37  ;;  %863 = vmatpush.msra.mxu3 %v856_v58  ;;  %v850_v0 = vld [vmem:[#allocation9 + $0x40] sm:$0xff]  ;;  %v849_v1 = vld [vmem:[#allocation9 + $0x38] sm:$0xff]  ;;  %v848_v3 = vld [vmem:[#allocation9 + $0x30] sm:$0xff] }
  0x6b   : > { %737 = vmatpush.msra.mxu0 %v712_v16  ;;  %781 = vmatpush.msra.mxu1 %v758_v23  ;;  %v1363_v2 = vld [vmem:[%s2016_s4] ss:$0 sm:$0xff]  ;;  %v847_v4 = vld [vmem:[#allocation9 + $0x28] sm:$0xff]  ;;  %v845_v9 = vld [vmem:[#allocation9 + $0x18] sm:$0xff] }
  0x6c   : > { %821 = vmatpush.msra.mxu2 %v808_v38  ;;  %864 = vmatpush.msra.mxu3 %v855_v59  ;;  %v846_v7 = vld [vmem:[#allocation9 + $0x20] sm:$0xff]  ;;  %v844_v13 = vld [vmem:[#allocation9 + $0x10] sm:$0xff]  ;;  %v843_v14 = vld [vmem:[#allocation9 + $0x8] sm:$0xff] }
  0x6d   : > { %738 = vmatpush.msra.mxu0 %v711_v18  ;;  %782 = vmatpush.msra.mxu1 %v757_v25  ;;  %v842_v15 = vld [vmem:[#allocation9] sm:$0xff]  ;;  %v902_v16 = vld [vmem:[#allocation10 + $0x78] sm:$0xff]  ;;  %v901_v17 = vld [vmem:[#allocation10 + $0x70] sm:$0xff] }
  0x6e   : > { %822 = vmatpush.msra.mxu2 %v807_v39  ;;  %865 = vmatpush.msra.mxu3 %v854_v60  ;;  %v900_v18 = vld [vmem:[#allocation10 + $0x68] sm:$0xff]  ;;  %v899_v19 = vld [vmem:[#allocation10 + $0x60] sm:$0xff]  ;;  %v897_v21 = vld [vmem:[#allocation10 + $0x50] sm:$0xff] }
  0x6f   : > { %739 = vmatpush.msra.mxu0 %v710_v20  ;;  %783 = vmatpush.msra.mxu1 %v756_v27  ;;  %v898_v20 = vld [vmem:[#allocation10 + $0x58] sm:$0xff]  ;;  %v895_v23 = vld [vmem:[#allocation10 + $0x40] sm:$0xff]  ;;  %v892_v27 = vld [vmem:[#allocation10 + $0x28] sm:$0xff] }
  0x70   : > { %823 = vmatpush.msra.mxu2 %v806_v40  ;;  %866 = vmatpush.msra.mxu3 %v853_v61  ;;  %v1364_v25 = vld [vmem:[%s2018_s6] ss:$0 sm:$0xff]  ;;  %v889_v36 = vld [vmem:[#allocation10 + $0x10] sm:$0xff]  ;;  %v888_v37 = vld [vmem:[#allocation10 + $0x8] sm:$0xff] }
  0x71   : > { %740 = vmatpush.msra.mxu0 %v709_v22  ;;  %784 = vmatpush.msra.mxu1 %v755_v29  ;;  %v896_v22 = vld [vmem:[#allocation10 + $0x48] sm:$0xff]  ;;  %v887_v38 = vld [vmem:[#allocation10] sm:$0xff]  ;;  %v947_v39 = vld [vmem:[#allocation12 + $0x78] sm:$0xff] }
  0x72   : > { %824 = vmatpush.msra.mxu2 %v805_v41  ;;  %867 = vmatpush.msra.mxu3 %v852_v62  ;;  %v946_v40 = vld [vmem:[#allocation12 + $0x70] sm:$0xff]  ;;  %v945_v41 = vld [vmem:[#allocation12 + $0x68] sm:$0xff]  ;;  %v932_v61 = vld [vmem:[#allocation12] sm:$0xff] }
  0x73   : > { %741 = vmatpush.msra.mxu0 %v708_v24  ;;  %785 = vmatpush.msra.mxu1 %v754_v31  ;;  %v894_v24 = vld [vmem:[#allocation10 + $0x38] sm:$0xff]  ;;  %v934_v59 = vld [vmem:[#allocation12 + $0x10] sm:$0xff]  ;;  %v933_v60 = vld [vmem:[#allocation12 + $0x8] sm:$0xff] }
  0x74   : > { %825 = vmatpush.msra.mxu2 %v804_v42  ;;  %868 = vmatpush.msra.mxu3 %v851_v63  ;;  %v944_v42 = vld [vmem:[#allocation12 + $0x60] sm:$0xff]  ;;  %v992_v62 = vld [vmem:[#allocation13 + $0x78] sm:$0xff]  ;;  %v991_v63 = vld [vmem:[#allocation13 + $0x70] sm:$0xff] }
  0x75   : > { %742 = vmatpush.msra.mxu0 %v707_v26  ;;  %786 = vmatpush.msra.mxu1 %v753_v32  ;;  %v893_v26 = vld [vmem:[#allocation10 + $0x30] sm:$0xff]  ;;  %v890_v32 = vld [vmem:[#allocation10 + $0x18] sm:$0xff] }
  0x76   : > { %743 = vmatmul.f32.vlgmr.msra.gmra.mxu0 %v705_v28  ;;  %826 = vmatpush.msra.mxu2 %v803_v44  ;;  %v942_v44 = vld [vmem:[#allocation12 + $0x50] sm:$0xff] }
  0x77   : > { %787 = vmatpush.msra.mxu1 %v752_v33  ;;  %869 = vmatpush.msra.mxu3 %v850_v0  ;;  %v990_v0 = vld [vmem:[#allocation13 + $0x68] sm:$0xff] }
  0x78   : > { %827 = vmatpush.msra.mxu2 %v802_v45  ;;  %907 = vmatpush.msrb.mxu0 %v902_v16  ;;  %v941_v45 = vld [vmem:[#allocation12 + $0x48] sm:$0xff] }
  0x79   : > { %870 = vmatpush.msra.mxu3 %v849_v1  ;;  %952 = vmatpush.msrb.mxu1 %v947_v39  ;;  %v989_v1 = vld [vmem:[#allocation13 + $0x60] sm:$0xff] }
  0x7a   : > { %828 = vmatpush.msra.mxu2 %v801_v48  ;;  %908 = vmatpush.msrb.mxu0 %v901_v17  ;;  %v1365_v48 = vld [vmem:[%s2020_s8] ss:$0 sm:$0xff] }
  0x7b   : > { %871 = vmatpush.msra.mxu3 %v848_v3  ;;  %953 = vmatpush.msrb.mxu1 %v946_v40  ;;  %v987_v3 = vld [vmem:[#allocation13 + $0x50] sm:$0xff] }
  0x7c   : > { %829 = vmatpush.msra.mxu2 %v800_v50  ;;  %909 = vmatpush.msrb.mxu0 %v900_v18  ;;  %v937_v50 = vld [vmem:[#allocation12 + $0x28] sm:$0xff]  ;;  %v979_v18 = vld [vmem:[#allocation13 + $0x10] sm:$0xff] }
  0x7d   : > { %872 = vmatpush.msra.mxu3 %v847_v4  ;;  %954 = vmatpush.msrb.mxu1 %v945_v41  ;;  %v986_v4 = vld [vmem:[#allocation13 + $0x48] sm:$0xff]  ;;  %v1024_v41 = vld [vmem:[#allocation15 + $0x10] sm:$0xff] }
  0x7e   : > { %746 = vmatmul.f32.gmra.mxu0 %v706_v30  ;;  %830 = vmatpush.msra.mxu2 %v799_v54  ;;  %v891_v30 = vld [vmem:[#allocation10 + $0x20] sm:$0xff] }
  0x7f   : > { %873 = vmatpush.msra.mxu3 %v846_v7  ;;  %910 = vmatpush.msrb.mxu0 %v899_v19  ;;  %v1366_v7 = vld [vmem:[%s2022_s10] ss:$0 sm:$0xff]  ;;  %v978_v19 = vld [vmem:[#allocation13 + $0x8] sm:$0xff] }
  0x80   : > { %831 = vmatpush.msra.mxu2 %v798_v55  ;;  %955 = vmatpush.msrb.mxu1 %v944_v42  ;;  %v935_v55 = vld [vmem:[#allocation12 + $0x18] sm:$0xff]  ;;  %v1023_v42 = vld [vmem:[#allocation15 + $0x8] sm:$0xff] }
  0x81   : > { %874 = vmatpush.msra.mxu3 %v845_v9  ;;  %911 = vmatpush.msrb.mxu0 %v898_v20  ;;  %v982_v9 = vld [vmem:[#allocation13 + $0x28] sm:$0xff]  ;;  %v977_v20 = vld [vmem:[#allocation13] sm:$0xff] }
  0x82   : > { %832 = vmatpush.msra.mxu2 %v797_v56 }
  0x83   : > { %875 = vmatpush.msra.mxu3 %v844_v13  ;;  %912 = vmatpush.msrb.mxu0 %v897_v21  ;;  %v1037_v21 = vld [vmem:[#allocation15 + $0x78] sm:$0xff] }
  0x84   : > { %997 = vmatpush.msrb.mxu2 %v992_v62 }
  0x85   : > { %876 = vmatpush.msra.mxu3 %v843_v14  ;;  %913 = vmatpush.msrb.mxu0 %v896_v22  ;;  %v980_v14 = vld [vmem:[#allocation13 + $0x18] sm:$0xff]  ;;  %v1036_v22 = vld [vmem:[#allocation15 + $0x70] sm:$0xff] }
  0x86   : > { %998 = vmatpush.msrb.mxu2 %v991_v63 }
  0x87   : > { %877 = vmatpush.msra.mxu3 %v842_v15  ;;  %914 = vmatpush.msrb.mxu0 %v895_v23  ;;  %v1035_v23 = vld [vmem:[#allocation15 + $0x68] sm:$0xff] }
  0x88   : > { %999 = vmatpush.msrb.mxu2 %v990_v0 }
  0x89   : > { %915 = vmatpush.msrb.mxu0 %v894_v24  ;;  %1042 = vmatpush.msrb.mxu3 %v1037_v21  ;;  %v1034_v24 = vld [vmem:[#allocation15 + $0x60] sm:$0xff] }
  0x8a   : > { %1000 = vmatpush.msrb.mxu2 %v989_v1 }
  0x8b   : > { %916 = vmatpush.msrb.mxu0 %v893_v26  ;;  %1043 = vmatpush.msrb.mxu3 %v1036_v22  ;;  %v1032_v26 = vld [vmem:[#allocation15 + $0x50] sm:$0xff] }
  0x8d   : > { %917 = vmatpush.msrb.mxu0 %v892_v27  ;;  %1044 = vmatpush.msrb.mxu3 %v1035_v23  ;;  %v1031_v27 = vld [vmem:[#allocation15 + $0x48] sm:$0xff] }
  0x8f   : > { %918 = vmatpush.msrb.mxu0 %v891_v30  ;;  %1045 = vmatpush.msrb.mxu3 %v1034_v24  ;;  %v1367_v30 = vld [vmem:[%s2055_s21] ss:$0 sm:$0xff] }
  0x91   : > { %919 = vmatpush.msrb.mxu0 %v890_v32  ;;  %v1027_v32 = vld [vmem:[#allocation15 + $0x28] sm:$0xff] }
  0x93   : > { %920 = vmatpush.msrb.mxu0 %v889_v36 }
  0x95   : > { %921 = vmatpush.msrb.mxu0 %v888_v37  ;;  %v1025_v37 = vld [vmem:[#allocation15 + $0x18] sm:$0xff] }
  0x97   : > { %922 = vmatpush.msrb.mxu0 %v887_v38 }
  0xf3   : > { %v744_v46 = vpop.f32.mrf.mxu0 }
  0xf4   : > { %v745_v47 = vadd.f32 %v1362_v43, %v744_v46  ;;  %v940_v46 = vld [vmem:[#allocation12 + $0x40] sm:$0xff] }
  0xf6   : > { %v750_v49 = vmax.f32 %v745_v47, 0.0  ;;  %v939_v47 = vld [vmem:[#allocation12 + $0x38] sm:$0xff] }
  0xf8   : > { %788 = vmatmul.f32.vlgmr.msra.gmra.mxu1 %v750_v49  ;;  %v938_v49 = vld [vmem:[#allocation12 + $0x30] sm:$0xff] }
  0xfb   : > { %v747_v51 = vpop.f32.mrf.mxu0 }
  0xfc   : > { %v748_v52 = vadd.f32 %v1362_v43, %v747_v51  ;;  %v943_v43 = vld [vmem:[#allocation12 + $0x58] sm:$0xff] }
  0xfd   : > { %956 = vmatpush.msrb.mxu1 %v943_v43  ;;  %v1022_v43 = vld [vmem:[#allocation15] sm:$0xff] }
  0xfe   : > { %v751_v53 = vmax.f32 %v748_v52, 0.0 }
  0xff   : > { %957 = vmatpush.msrb.mxu1 %v942_v44  ;;  %v1368_v44 = vld [vmem:[%s2056_s3] ss:$0 sm:$0xff] }
 0x100   : > { %791 = vmatmul.f32.gmra.mxu1 %v751_v53  ;;  %v936_v53 = vld [vmem:[#allocation12 + $0x20] sm:$0xff] }
 0x101   : > { %958 = vmatpush.msrb.mxu1 %v941_v45 }
 0x103   : > { %959 = vmatpush.msrb.mxu1 %v940_v46 }
 0x105   : > { %960 = vmatpush.msrb.mxu1 %v939_v47 }
 0x107   : > { %961 = vmatpush.msrb.mxu1 %v938_v49 }
 0x109   : > { %962 = vmatpush.msrb.mxu1 %v937_v50 }
 0x10b   : > { %963 = vmatpush.msrb.mxu1 %v936_v53 }
 0x10d   : > { %964 = vmatpush.msrb.mxu1 %v935_v55 }
 0x10f   : > { %965 = vmatpush.msrb.mxu1 %v934_v59 }
 0x111   : > { %966 = vmatpush.msrb.mxu1 %v933_v60 }
 0x113   : > { %967 = vmatpush.msrb.mxu1 %v932_v61 }
 0x175   : > { %v789_v5 = vpop.f32.mrf.mxu1 }
 0x176   : > { %v790_v6 = vadd.f32 %v1363_v2, %v789_v5  ;;  %v985_v5 = vld [vmem:[#allocation13 + $0x40] sm:$0xff] }
 0x178   : > { %v795_v8 = vmax.f32 %v790_v6, 0.0  ;;  %v984_v6 = vld [vmem:[#allocation13 + $0x38] sm:$0xff] }
 0x17a   : > { %833 = vmatmul.f32.vlgmr.msra.gmra.mxu2 %v795_v8  ;;  %v983_v8 = vld [vmem:[#allocation13 + $0x30] sm:$0xff] }
 0x17d   : > { %v792_v10 = vpop.f32.mrf.mxu1 }
 0x17e   : > { %v793_v11 = vadd.f32 %v1363_v2, %v792_v10  ;;  %v988_v2 = vld [vmem:[#allocation13 + $0x58] sm:$0xff] }
 0x17f   : > { %1001 = vmatpush.msrb.mxu2 %v988_v2 }
 0x180   : > { %v796_v12 = vmax.f32 %v793_v11, 0.0 }
 0x181   : > { %1002 = vmatpush.msrb.mxu2 %v987_v3 }
 0x182   : > { %836 = vmatmul.f32.gmra.mxu2 %v796_v12  ;;  %v981_v12 = vld [vmem:[#allocation13 + $0x20] sm:$0xff] }
 0x183   : > { %1003 = vmatpush.msrb.mxu2 %v986_v4 }
 0x185   : > { %1004 = vmatpush.msrb.mxu2 %v985_v5 }
 0x187   : > { %1005 = vmatpush.msrb.mxu2 %v984_v6 }
 0x189   : > { %1006 = vmatpush.msrb.mxu2 %v983_v8 }
 0x18b   : > { %1007 = vmatpush.msrb.mxu2 %v982_v9 }
 0x18d   : > { %1008 = vmatpush.msrb.mxu2 %v981_v12 }
 0x18f   : > { %1009 = vmatpush.msrb.mxu2 %v980_v14 }
 0x191   : > { %1010 = vmatpush.msrb.mxu2 %v979_v18 }
 0x193   : > { %1011 = vmatpush.msrb.mxu2 %v978_v19 }
 0x195   : > { %1012 = vmatpush.msrb.mxu2 %v977_v20 }
 0x1fd   : > { %v834_v28 = vpop.f32.mrf.mxu2 }
 0x1fe   : > { %v835_v29 = vadd.f32 %v1364_v25, %v834_v28  ;;  %v1030_v28 = vld [vmem:[#allocation15 + $0x40] sm:$0xff] }
 0x200   : > { %v840_v31 = vmax.f32 %v835_v29, 0.0  ;;  %v1029_v29 = vld [vmem:[#allocation15 + $0x38] sm:$0xff] }
 0x202   : > { %878 = vmatmul.f32.vlgmr.msra.gmra.mxu3 %v840_v31  ;;  %v1028_v31 = vld [vmem:[#allocation15 + $0x30] sm:$0xff] }
 0x205   : > { %v837_v33 = vpop.f32.mrf.mxu2 }
 0x206   : > { %v838_v34 = vadd.f32 %v1364_v25, %v837_v33  ;;  %v1033_v25 = vld [vmem:[#allocation15 + $0x58] sm:$0xff] }
 0x207   : > { %1046 = vmatpush.msrb.mxu3 %v1033_v25 }
 0x208   : > { %v841_v35 = vmax.f32 %v838_v34, 0.0 }
 0x209   : > { %1047 = vmatpush.msrb.mxu3 %v1032_v26 }
 0x20a   : > { %881 = vmatmul.f32.gmra.mxu3 %v841_v35  ;;  %v1026_v35 = vld [vmem:[#allocation15 + $0x20] sm:$0xff] }
 0x20b   : > { %1048 = vmatpush.msrb.mxu3 %v1031_v27 }
 0x20d   : > { %1049 = vmatpush.msrb.mxu3 %v1030_v28 }
 0x20f   : > { %1050 = vmatpush.msrb.mxu3 %v1029_v29 }
 0x211   : > { %1051 = vmatpush.msrb.mxu3 %v1028_v31 }
 0x213   : > { %1052 = vmatpush.msrb.mxu3 %v1027_v32 }
 0x215   : > { %1053 = vmatpush.msrb.mxu3 %v1026_v35 }
 0x217   : > { %1054 = vmatpush.msrb.mxu3 %v1025_v37 }
 0x219   : > { %1055 = vmatpush.msrb.mxu3 %v1024_v41 }
 0x21b   : > { %1056 = vmatpush.msrb.mxu3 %v1023_v42 }
 0x21d   : > { %1057 = vmatpush.msrb.mxu3 %v1022_v43 }
 0x285   : > { %v879_v51 = vpop.f32.mrf.mxu3 }
 0x286   : > { %v880_v52 = vadd.f32 %v1365_v48, %v879_v51  ;;  %v1369_v51 = vld [vmem:[%s2058_s24] ss:$0 sm:$0xff] }
 0x288   : > { %v885_v54 = vmax.f32 %v880_v52, 0.0 }
 0x28a   : > { %923 = vmatmul.f32.vlgmr.msrb.gmra.mxu0 %v885_v54 }
 0x28d   : > { %v882_v56 = vpop.f32.mrf.mxu3 }
 0x28e   : > { %v883_v57 = vadd.f32 %v1365_v48, %v882_v56 }
 0x290   : > { %v886_v58 = vmax.f32 %v883_v57, 0.0 }
 0x292   : > { %926 = vmatmul.f32.gmra.mxu0 %v886_v58 }
 0x307   : > { %v924_v10 = vpop.f32.mrf.mxu0 }
 0x308   : > { %v925_v11 = vadd.f32 %v1366_v7, %v924_v10 }
 0x30a   : > { %v930_v13 = vmax.f32 %v925_v11, 0.0 }
 0x30c   : > { %968 = vmatmul.f32.vlgmr.msrb.gmra.mxu1 %v930_v13 }
 0x30f   : > { %v927_v15 = vpop.f32.mrf.mxu0 }
 0x310   : > { %v928_v16 = vadd.f32 %v1366_v7, %v927_v15 }
 0x312   : > { %v931_v17 = vmax.f32 %v928_v16, 0.0 }
 0x314   : > { %971 = vmatmul.f32.gmra.mxu1 %v931_v17 }
 0x389   : > { %v969_v33 = vpop.f32.mrf.mxu1 }
 0x38a   : > { %v970_v34 = vadd.f32 %v1367_v30, %v969_v33 }
 0x38c   : > { %v975_v36 = vmax.f32 %v970_v34, 0.0 }
 0x38e   : > { %1013 = vmatmul.f32.vlgmr.msrb.gmra.mxu2 %v975_v36 }
 0x391   : > { %v972_v38 = vpop.f32.mrf.mxu1 }
 0x392   : > { %v973_v39 = vadd.f32 %v1367_v30, %v972_v38 }
 0x394   : > { %v976_v40 = vmax.f32 %v973_v39, 0.0 }
 0x396   : > { %1016 = vmatmul.f32.gmra.mxu2 %v976_v40 }
 0x411   : > { %v1014_v45 = vpop.f32.mrf.mxu2 }
 0x412   : > { %v1015_v46 = vadd.f32 %v1368_v44, %v1014_v45 }
 0x414   : > { %v1020_v47 = vmax.f32 %v1015_v46, 0.0 }
 0x416   : > { %1058 = vmatmul.f32.vlgmr.msrb.gmra.mxu3 %v1020_v47 }
 0x419   : > { %v1017_v48 = vpop.f32.mrf.mxu2 }
 0x41a   : > { %v1018_v49 = vadd.f32 %v1368_v44, %v1017_v48 }
 0x41c   : > { %v1021_v50 = vmax.f32 %v1018_v49, 0.0 }
 0x41e   : > { %1061 = vmatmul.f32.gmra.mxu3 %v1021_v50 }
 0x499   : > { %v1059_v52 = vpop.f32.mrf.mxu3 }
 0x49a   : > { %v1060_v53 = vadd.f32 %v1369_v51, %v1059_v52 }
 0x49c   : > { %1065 = vst [vmem:[%s703_s18] sm:$0xff] %v1060_v53 }
 0x4a1   : > { %v1062_v54 = vpop.f32.mrf.mxu3 }
 0x4a2   : > { %v1063_v55 = vadd.f32 %v1369_v51, %v1062_v54 }
 0x4a4   : > { %1066 = vst [vmem:[%s703_s18 + $0x8] sm:$0xff] %v1063_v55 }
 0x4a5 PF: > { %p31_p3 = scmp.ge.s32.totalorder %s1898_s5, 4   ;;  %s2060_s24 = smov %s1682_s25 }
 0x4a6   : > { %s2061_s25 = smov %s1686_s26  ;;  %s2062_s26 = smov %s1909_s23 }
 0x4a7   : > { %s2063_s27 = smov %s1898_s5  ;;  %33 = sbr.rel (!%p31_p3) target bundleno = 17 (0x11), region = 160 }
 0x4ac   :  { %1089 = vsyncpa [#allocation3], 1 }
 0x4ad   :  { %1091 = vsyncpa [#allocation3 + $0x1], 1 }
 0x4ae   :  { %1092 = vsyncpa [#allocation5], 1 }
 0x4af   :  { %1093 = vsyncpa [#allocation8], 1 }
 0x4b0   :  { %1094 = vsyncpa [#allocation11], 1 }
 0x4b1   :  { %1095 = vsyncpa [#allocation14], 1 }

</bundles_post_ra>
